<compile_context>
chip_gen: v7x
topology: tpu7x:2x2x1
jax: 0.10.0
libtpu: 0.0.40
codegen_flags: <defaults>
</compile_context>

<pallas_src>
import math

import jax
import jax.numpy as jnp
from jax.experimental import pallas as pl
from jax.experimental.pallas import tpu as pltpu


def mlp_kernel(x_ref, w0_ref, b0_ref, w1_ref, b1_ref, out_ref):
    # x: (TB, in)   w0: (in, hidden)   b0: (1, hidden)
    # w1: (hidden, out)                b1: (1, out)
    x = x_ref[...].astype(jnp.float32)
    h = jnp.dot(x, w0_ref[...], preferred_element_type=jnp.float32)   # MXU, no transpose
    h = jnp.maximum(h + b0_ref[...], 0.0)                             # bias + ReLU

    logit = jnp.dot(h, w1_ref[...], preferred_element_type=jnp.float32)  # MXU, no transpose
    logit = logit + b1_ref[...]

    # Numerically stable softmax over features (dim=1), exact divide so rows
    # sum to 1 to f32 precision (probs feed samplers / log-prob terms).
    m = jnp.max(logit, axis=1, keepdims=True)
    e = jnp.exp(logit - m)
    denom = jnp.sum(e, axis=1, keepdims=True)
    out_ref[...] = (e / denom).astype(out_ref.dtype)


def mlp_forward(x, w0t, b0, w1t, b1, *, tile_b=512):
    """x: (B, in). Params are stored PRE-TRANSPOSED:
    w0t (in, hidden), b0 (1, hidden), w1t (hidden, out), b1 (1, out)."""
    B, in_size = x.shape
    hidden = w0t.shape[1]
    out_size = w1t.shape[1]

    # Tile the batch; pad to a multiple of the tile instead of asserting.
    tile_b = min(tile_b, B)
    n_tiles = pl.cdiv(B, tile_b)
    B_pad = n_tiles * tile_b
    if B_pad != B:
        x = jnp.pad(x, ((0, B_pad - B), (0, 0)))
    grid = (n_tiles,)

    resident = lambda shape: pl.BlockSpec(shape, lambda i: (0, 0))

    flops = 2 * B_pad * (in_size * hidden + hidden * out_size)
    bytes_accessed = 4 * (B_pad * in_size + w0t.size + b0.size + w1t.size
                          + b1.size + B_pad * out_size)
    cost = pl.CostEstimate(flops=flops,
                           transcendentals=B_pad * out_size,
                           bytes_accessed=bytes_accessed)

    out = pl.pallas_call(
        mlp_kernel,
        out_shape=jax.ShapeDtypeStruct((B_pad, out_size), jnp.float32),
        grid=grid,
        in_specs=[
            pl.BlockSpec((tile_b, in_size), lambda i: (i, 0)),   # x: tiled over batch
            resident((in_size, hidden)),                         # weights stay in VMEM
            resident((1, hidden)),
            resident((hidden, out_size)),
            resident((1, out_size)),
        ],
        out_specs=pl.BlockSpec((tile_b, out_size), lambda i: (i, 0)),
        compiler_params=pltpu.CompilerParams(
            dimension_semantics=("parallel",)),   # batch tiles -> both TCs on v7x
        cost_estimate=cost,
    )(x, w0t, b0, w1t, b1)

    if B_pad != B:
        out = out[:B]
    return out


def init_params(key, in_size, hidden, out_size):
    """Deterministic init matching the PyTorch module.

    Weights: kaiming_uniform_ (fan_in mode, gain=sqrt(2)); biases: PyTorch
    Linear default uniform(-1/sqrt(fan_in), 1/sqrt(fan_in)).
    Weights are returned PRE-TRANSPOSED ([in,hidden], [hidden,out]) so the
    kernel contraction is transpose-free and no per-call transpose HLO is emitted."""
    k0, k1, k2, k3 = jax.random.split(key, 4)

    def kaiming_uniform(k, fan_out, fan_in):
        bound = math.sqrt(6.0 / fan_in)
        return jax.random.uniform(k, (fan_out, fan_in), jnp.float32, -bound, bound)

    def bias_uniform(k, fan_out, fan_in):
        bound = 1.0 / math.sqrt(fan_in)
        return jax.random.uniform(k, (1, fan_out), jnp.float32, -bound, bound)

    w0 = kaiming_uniform(k0, hidden, in_size)       # PyTorch layout (hidden, in)
    b0 = bias_uniform(k1, hidden, in_size)
    w1 = kaiming_uniform(k2, out_size, hidden)      # PyTorch layout (out, hidden)
    b1 = bias_uniform(k3, out_size, hidden)
    return w0.T, b0, w1.T, b1                       # store pre-transposed, once


def mlp_ref(x, w0t, b0, w1t, b1):
    """Pure-JAX reference mirroring the kernel numerics (f32 throughout)."""
    h = jnp.dot(x, w0t, preferred_element_type=jnp.float32) + b0
    h = jnp.maximum(h, 0.0)
    logit = jnp.dot(h, w1t, preferred_element_type=jnp.float32) + b1
    return jax.nn.softmax(logit, axis=1)


if __name__ == "__main__":
    # Small shapes consistent with the module: MLP(in_size=16, out_size=8, hidde_size=(64,))
    B, in_size, hidden, out_size = 8, 16, 64, 8

    key = jax.random.PRNGKey(0)
    kx, kp = jax.random.split(key)
    x = jax.random.normal(kx, (B, in_size), jnp.float32)
    w0t, b0, w1t, b1 = init_params(kp, in_size, hidden, out_size)

    out = mlp_forward(x, w0t, b0, w1t, b1)
    out = jax.block_until_ready(out)

    ref = mlp_ref(x, w0t, b0, w1t, b1)
    assert out.shape == (B, out_size)
    assert jnp.allclose(out, ref, atol=1e-3, rtol=1e-3), "mismatch vs. pure-JAX reference"
    # Exact softmax divide -> rows sum to 1 to f32 precision.
    assert jnp.allclose(jnp.sum(out, axis=1), jnp.ones((B,)), atol=1e-4)

    print("KERNEL_OK")
</pallas_src>

<mosaic_0001>
module attributes {stable_mosaic.version = 11 : i64} {
  func.func @mlp_kernel(%arg0: i32, %arg1: memref<8x16xf32, #tpu.memory_space<vmem>>, %arg2: memref<16x64xf32, #tpu.memory_space<vmem>>, %arg3: memref<1x64xf32, #tpu.memory_space<vmem>>, %arg4: memref<64x8xf32, #tpu.memory_space<vmem>>, %arg5: memref<1x8xf32, #tpu.memory_space<vmem>>, %arg6: memref<8x8xf32, #tpu.memory_space<vmem>>) attributes {dimension_semantics = [#tpu.dimension_semantics<parallel>], iteration_bounds = array<i64: 1>, scalar_prefetch = 0 : i64, scratch_operands = 0 : i64, tpu.core_type = #tpu.core_type<tc>, window_params = [{transform_indices = @transform_0, window_bounds = array<i64: 8, 16>}, {pipeline_mode = #tpu.pipeline_mode<synchronous>, transform_indices = @transform_1, window_bounds = array<i64: 16, 64>}, {pipeline_mode = #tpu.pipeline_mode<synchronous>, transform_indices = @transform_2, window_bounds = array<i64: 1, 64>}, {pipeline_mode = #tpu.pipeline_mode<synchronous>, transform_indices = @transform_3, window_bounds = array<i64: 64, 8>}, {pipeline_mode = #tpu.pipeline_mode<synchronous>, transform_indices = @transform_4, window_bounds = array<i64: 1, 8>}, {transform_indices = @transform_5, window_bounds = array<i64: 8, 8>}]} {
    %c0 = arith.constant 0 : index
    %c0_0 = arith.constant 0 : index
    %0 = vector.load %arg1[%c0, %c0_0] : memref<8x16xf32, #tpu.memory_space<vmem>>, vector<8x16xf32>
    %c0_1 = arith.constant 0 : index
    %c0_2 = arith.constant 0 : index
    %1 = vector.load %arg2[%c0_1, %c0_2] : memref<16x64xf32, #tpu.memory_space<vmem>>, vector<16x64xf32>
    %cst = arith.constant dense<0.000000e+00> : vector<8x64xf32>
    %2 = tpu.matmul %0, %1, %cst {dimension_numbers = #tpu.dot_dimension_numbers<[1], [0], [0], [1], [0, 0, 1, 1], [], []>} : vector<8x16xf32>, vector<16x64xf32>, vector<8x64xf32> -> vector<8x64xf32>
    %c0_3 = arith.constant 0 : index
    %c0_4 = arith.constant 0 : index
    %3 = vector.load %arg3[%c0_3, %c0_4] : memref<1x64xf32, #tpu.memory_space<vmem>>, vector<1x64xf32>
    %4 = vector.broadcast %3 : vector<1x64xf32> to vector<8x64xf32>
    %5 = arith.addf %2, %4 : vector<8x64xf32>
    %cst_5 = arith.constant 0.000000e+00 : f32
    %6 = vector.broadcast %cst_5 : f32 to vector<8x64xf32>
    %7 = arith.maximumf %5, %6 : vector<8x64xf32>
    %c0_6 = arith.constant 0 : index
    %c0_7 = arith.constant 0 : index
    %8 = vector.load %arg4[%c0_6, %c0_7] : memref<64x8xf32, #tpu.memory_space<vmem>>, vector<64x8xf32>
    %cst_8 = arith.constant dense<0.000000e+00> : vector<8x8xf32>
    %9 = tpu.matmul %7, %8, %cst_8 {dimension_numbers = #tpu.dot_dimension_numbers<[1], [0], [0], [1], [0, 0, 1, 1], [], []>} : vector<8x64xf32>, vector<64x8xf32>, vector<8x8xf32> -> vector<8x8xf32>
    %c0_9 = arith.constant 0 : index
    %c0_10 = arith.constant 0 : index
    %10 = vector.load %arg5[%c0_9, %c0_10] : memref<1x8xf32, #tpu.memory_space<vmem>>, vector<1x8xf32>
    %11 = vector.broadcast %10 : vector<1x8xf32> to vector<8x8xf32>
    %12 = arith.addf %9, %11 : vector<8x8xf32>
    %cst_11 = arith.constant dense<0xFF800000> : vector<8xf32>
    %13 = vector.multi_reduction <maximumf>, %12, %cst_11 [1] : vector<8x8xf32> to vector<8xf32>
    %14 = vector.shape_cast %13 : vector<8xf32> to vector<8x1xf32>
    %15 = vector.broadcast %14 : vector<8x1xf32> to vector<8x8xf32>
    %16 = arith.subf %12, %15 : vector<8x8xf32>
    %17 = math.exp %16 : vector<8x8xf32>
    %cst_12 = arith.constant dense<0.000000e+00> : vector<8xf32>
    %18 = vector.multi_reduction <add>, %17, %cst_12 [1] : vector<8x8xf32> to vector<8xf32>
    %19 = vector.shape_cast %18 : vector<8xf32> to vector<8x1xf32>
    %20 = vector.broadcast %19 : vector<8x1xf32> to vector<8x8xf32>
    %21 = arith.divf %17, %20 : vector<8x8xf32>
    %c0_13 = arith.constant 0 : index
    %c0_14 = arith.constant 0 : index
    %22 = vector.load %arg6[%c0_13, %c0_14] : memref<8x8xf32, #tpu.memory_space<vmem>>, vector<8x8xf32>
    tpu.vector_store %arg6[%c0_13, %c0_14], %21 {strides = array<i32>} : memref<8x8xf32, #tpu.memory_space<vmem>>, vector<8x8xf32>,
    return
  }
  func.func @transform_0(%arg0: i32) -> (i32, i32) {
    %c0_i32 = arith.constant 0 : i32
    %c0_i32_0 = arith.constant 0 : i32
    return %arg0, %c0_i32 : i32, i32
  }
  func.func @transform_1(%arg0: i32) -> (i32, i32) {
    %c0_i32 = arith.constant 0 : i32
    %c0_i32_0 = arith.constant 0 : i32
    %c0_i32_1 = arith.constant 0 : i32
    return %c0_i32, %c0_i32_0 : i32, i32
  }
  func.func @transform_2(%arg0: i32) -> (i32, i32) {
    %c0_i32 = arith.constant 0 : i32
    %c0_i32_0 = arith.constant 0 : i32
    %c0_i32_1 = arith.constant 0 : i32
    return %c0_i32, %c0_i32_0 : i32, i32
  }
  func.func @transform_3(%arg0: i32) -> (i32, i32) {
    %c0_i32 = arith.constant 0 : i32
    %c0_i32_0 = arith.constant 0 : i32
    %c0_i32_1 = arith.constant 0 : i32
    return %c0_i32, %c0_i32_0 : i32, i32
  }
  func.func @transform_4(%arg0: i32) -> (i32, i32) {
    %c0_i32 = arith.constant 0 : i32
    %c0_i32_0 = arith.constant 0 : i32
    %c0_i32_1 = arith.constant 0 : i32
    return %c0_i32, %c0_i32_0 : i32, i32
  }
  func.func @transform_5(%arg0: i32) -> (i32, i32) {
    %c0_i32 = arith.constant 0 : i32
    %c0_i32_0 = arith.constant 0 : i32
    return %arg0, %c0_i32 : i32, i32
  }
}

</mosaic_0001>

<bundles_post_ra>
// kernel: tpu_custom_call.1
= control target key start
LH: loop header
LB: loop body
LE: loop exit
PB: predicated region body
PF: predicated region fallthrough
CT: control target
= control target key end

     0   :  { %v311_v2 = vmov 0.0|0.0   ;;  %vm312_vm0 = vmmov 0   ;;  %v313_v4 = vmov 0.0   ;;  %vm31_vm1 = vcmask 130048   ;;  %s399_s0 = inlined_call_operand.vmem [shape: f32[8,16], index: 0, kind: input, shape index: {}]   ;;  %s400_s1 = inlined_call_operand.vmem [shape: f32[16,64], index: 1, kind: input, shape index: {}]   ;;  %s401_s2 = inlined_call_operand.vmem [shape: f32[1,64], index: 2, kind: input, shape index: {}]   ;;  %s402_s3 = inlined_call_operand.vmem [shape: f32[64,8], index: 3, kind: input, shape index: {}]   ;;  %s403_s4 = inlined_call_operand.vmem [shape: f32[1,8], index: 4, kind: input, shape index: {}]   ;;  %s404_s5 = inlined_call_operand.hbm [shape: f32[8,8], index: 5, kind: output, shape index: {}]  }
   0x1   :  { %v22_v0 = vld [vmem:[%s400_s1] sm:$0xff]  ;;  %v23_v1 = vld [vmem:[%s400_s1 + $0x8] sm:$0xff]  ;;  %264 = vmatprep.subr.bf16.mxu0 %v311_v2  ;;  %242 = vmatprep.mubr.msk.f32.mxu0 %vm312_vm0, %v313_v4  ;;  %v108_v7 = vld [vmem:[%s402_s3 + $0x10] sm:$0xff] }
   0x2   :  { %v265_v3 = vpack.c.bf16 %v23_v1, %v22_v0  ;;  %v106_v5 = vld [vmem:[%s402_s3] sm:$0xff]  ;;  %v107_v6 = vld [vmem:[%s402_s3 + $0x8] sm:$0xff]  ;;  %267 = vmatprep.subr.bf16.mxu1 %v311_v2  ;;  %v109_v9 = vld [vmem:[%s402_s3 + $0x18] sm:$0xff]  ;;  %261 = vmatprep.mubr.msk.f32.mxu1 %vm312_vm0, %v313_v4 }
   0x3   :  { %v268_v8 = vpack.c.bf16 %v107_v6, %v106_v5  ;;  %v21_v10 = vld [vmem:[%s399_s0] sm:$0xff] }
   0x4   :  { %266 = vmatpush3.bf16.msra.mxu0 %v265_v3 }
   0x5   :  { %10 = vsyncpa [#allocation3], 0  ;;  %269 = vmatpush3.bf16.msra.mxu1 %v268_v8  ;;  %v271_v11 = vpack.c.bf16 %v109_v9, %v108_v7  ;;  %v110_v12 = vld [vmem:[%s402_s3 + $0x20] sm:$0xff]  ;;  %v111_v13 = vld [vmem:[%s402_s3 + $0x28] sm:$0xff]  ;;  %vm121_vm2 = vcmask 523264   ;;  %vm195_vm3 = vcmask 64512  }
   0x6   :  { %270 = vmatprep.subr.bf16.mxu1 %v311_v2  ;;  %v274_v14 = vpack.c.bf16 %v111_v13, %v110_v12  ;;  %v112_v15 = vld [vmem:[%s402_s3 + $0x30] sm:$0xff]  ;;  %v113_v16 = vld [vmem:[%s402_s3 + $0x38] sm:$0xff]  ;;  %v222_v18 = vld [vmem:[%s401_s2] ss:$0 sm:$0xff]  ;;  %s314_s2 = smov [#allocation2]  }
   0x7   :  { %243 = vmatmul.mubr.msk.f32.vlgmr.msra.gmra.mrb[0].mxu0 %vm31_vm1, %v21_v10  ;;  %v277_v17 = vpack.c.bf16 %v113_v16, %v112_v15  ;;  %v224_v23 = vld [vmem:[%s403_s4] ss:$0 sm:$0xff]  ;;  %s214_s3 = sshll.u32 %s314_s2, 4  ;;  %s215_s3 = int_to_ptr.vmem [resolvable:$true] %s214_s3 }
   0x8   :  { %s287_s4 = scalar_lea.vmem %s215_s3, 128  ;;  %p292_p1 = scmp.lt.s32.totalorder %s215_s3, %s215_s3 }
   0x9   :  { %272 = vmatpush3.bf16.msra.mxu1 %v271_v11  ;;  %p288_p0 = scmp.ne.s32.totalorder %s215_s3, %s287_s4  ;;  %p293_p2 = scmp.lt.s32.totalorder %s287_s4, %s287_s4 }
   0xa   :  { %273 = vmatprep.subr.bf16.mxu1 %v311_v2 }
   0xb   :  { %p294_p3 = por %p293_p2, %p292_p1 }
   0xd   :  { %275 = vmatpush3.bf16.msra.mxu1 %v274_v14  ;;  %p295_p4 = pnand %p294_p3, %p288_p0 }
   0xe   :  { %276 = vmatprep.subr.bf16.mxu1 %v311_v2 }
  0x11   :  { %278 = vmatpush3.bf16.msra.mxu1 %v277_v17 }
  0xda   :  { %v101_v19 = vpop.f32.mrb[0].mxu0 }
  0xdb   :  { %v102_v20 = vadd.f32 %v222_v18, %v101_v19  ;;  %v244_v21 = vpop.f32.mrb[1].mxu0 }
  0xdd   :  { %v105_v22 = vmax.f32 %v102_v20, 0.0 }
  0xdf   :  { %262 = vmatmul.mubr.msk.f32.vlgmr.msra.gmra.mrb[0].mxu1 %vm121_vm2, %v105_v22 }
 0x1b2   :  { %v191_v24 = vpop.f32.mrb[0].mxu1 }
 0x1b3   :  { %v192_v25 = vadd.f32 %v224_v23, %v191_v24  ;;  %v263_v26 = vpop.f32.mrb[1].mxu1 }
 0x1b5   :  { %v196_v27 = vsel %vm195_vm3, %v192_v25, -inf }
 0x1b6   :  { %197 = vmax.xlane.f32.xlu0 %v196_v27 }
 0x243   :  { %v198_v28 = vpop.xlane.xlu0 %197 }
 0x244   :  { %v199_v29 = vsub.f32 %v192_v25, %v198_v28 }
 0x246   :  { %v200_v30 = vmul.f32 1.442695, %v199_v29 }
 0x248   :  { %283 = vpow2.f32 %v200_v30 }
 0x252   :  { %v284_v31 = vpop.eup %283 }
 0x253   :  { %v202_v32 = vsel %vm195_vm3, %v284_v31, 0.0 }
 0x254   :  { %203 = vadd.xlane.f32.xlu0 %v202_v32 }
 0x2e1   :  { %v204_v33 = vpop.xlane.xlu0 %203 }
 0x2e2   :  { %285 = vrcp.f32 %v204_v33 }
 0x2ec   :  { %v286_v34 = vpop.eup %285 }
 0x2ed   :  { %v206_v35 = vmul.f32 %v286_v34, %v284_v31 }
 0x2ef   :  { %207 = vst.msk [vmem:[#allocation2] sm:$0xff] %vm195_vm3, %v206_v35 }
 0x2f0   :  { %298 = shalt.err (!%p295_p4)
}
 0x2f1   :  { %s299_s19 = scalar_lea.hbm %s404_s5, 128 }
 0x2f2   :  { %p300_p5 = scmp.ne.s32.totalorder %s404_s5, %s299_s19  ;;  %p303_p6 = scmp.lt.u32.totalorder %s299_s19, %s404_s5 }
 0x2f4   :  { %p305_p7 = pnand %p303_p6, %p300_p5 }
 0x2f6   :  { %308 = shalt.err (!%p305_p7)
}
 0x2f7   :  { %217 = dma.vmem_to_hbm [thread:$0]  %s215_s3, 128, %s404_s5, [#allocation3]  }
 0x2f8   :  { %309 = dma.done.wait [#allocation3], 128  }
 0x2f9   :  { %310 = vsyncadd [#allocation3], 4294967168 }
 0x2fa   :  { %221 = vsyncpa [#allocation3], 1 }

</bundles_post_ra>
